<compile_context>
chip_gen: v7x
topology: tpu7x:2x2x1
jax: 0.10.0
libtpu: 0.0.40
codegen_flags: <defaults>
</compile_context>

<pallas_src>
import functools

import jax
import jax.numpy as jnp
from jax.experimental import pallas as pl
from jax.experimental.pallas import tpu as pltpu


def _round_up(x, m):
    return ((x + m - 1) // m) * m


def _mlp_kernel(*refs, n_layers):
    """Fused DQN MLP forward for one (TB, F_in) batch tile.

    refs = (x_ref, w0, b0, w1, b1, ..., w_out, b_out, o_ref)

    ReLU after every layer except the output head (matching DQN.forward:
    relu(input_layer), relu(hidden_layer_i), then plain output_layer).
    bf16 MXU matmuls with f32 accumulation; bias add / ReLU in f32.
    """
    x_ref = refs[0]
    o_ref = refs[-1]
    params = refs[1:-1]

    h = x_ref[...]                                        # (TB, F_in), caller dtype
    for i in range(n_layers):
        w = params[2 * i][...]                            # (in_i, out_i) bf16
        b = params[2 * i + 1][...]                        # (1, out_i)    f32
        lhs = h if h.dtype == jnp.bfloat16 else h.astype(jnp.bfloat16)
        h = jnp.dot(lhs, w, preferred_element_type=jnp.float32) + b
        if i < n_layers - 1:
            h = jnp.maximum(h, 0.0)                       # ReLU (not on head)
        # TODO(synk): Dropout1d(0.5) after each hidden Linear is identity in
        # eval mode; training-mode stochastic dropout intentionally omitted.
    o_ref[...] = h.astype(o_ref.dtype)


def dqn_forward(x, weights, biases, *, block_b=2048):
    """x: (B, L, W) float32 or bfloat16 (bf16 is the fast path).

    weights[i]: (in_i, out_i). biases[i]: (out_i,). Returns (B, n_actions) f32.
    """
    assert x.ndim == 3, "Please have at least 1 in the batch dimension."
    B, L, W = x.shape
    f_in = L * W
    # Keep the caller's dtype: an extra wrapper-side astype would be a
    # separate un-hidden HBM pass. Pass bf16 in for the mem-bound fast path.
    x_flat = x.reshape(B, f_in)

    n_layers = len(weights)
    n_actions = weights[-1].shape[1]

    # Batch tiling: tb multiple of 8 sublanes; cap so the grid has >=2 tiles
    # whenever the batch allows (v7x has 2 TensorCores to shard across).
    tb_two = _round_up(pl.cdiv(B, 2), 8)
    tb = max(8, min(_round_up(block_b, 8), tb_two, _round_up(B, 8)))
    b_pad = _round_up(B, tb)
    if b_pad != B:
        x_flat = jnp.pad(x_flat, ((0, b_pad - B), (0, 0)))

    # Weights as (in, out) bf16; biases as (1, out) f32 rows. No output-head
    # padding: the tiny (tb, n_actions) store is hidden under DMA slack.
    flat_params = []
    for w, b in zip(weights, biases):
        flat_params.append(w.astype(jnp.bfloat16))
        flat_params.append(b.reshape(1, -1).astype(jnp.float32))

    # Weights/biases: whole-array blocks, constant index_map, single pipeline
    # buffer -> VMEM-resident across all batch tiles, one DMA each.
    param_specs = [
        pl.BlockSpec(p.shape, lambda i: (0, 0), pipeline_mode=pl.Buffered(1))
        for p in flat_params
    ]
    x_spec = pl.BlockSpec((tb, f_in), lambda i: (i, 0))
    out_spec = pl.BlockSpec((tb, n_actions), lambda i: (i, 0))

    kernel = functools.partial(_mlp_kernel, n_layers=n_layers)

    flops = 2 * b_pad * sum(int(w.shape[0]) * int(w.shape[1]) for w in weights)
    bytes_accessed = (
        x_flat.size * x_flat.dtype.itemsize
        + sum(p.size * p.dtype.itemsize for p in flat_params)
        + b_pad * n_actions * 4
    )

    out = pl.pallas_call(
        kernel,
        out_shape=jax.ShapeDtypeStruct((b_pad, n_actions), jnp.float32),
        grid=(b_pad // tb,),
        in_specs=[x_spec] + param_specs,
        out_specs=out_spec,
        compiler_params=pltpu.CompilerParams(
            dimension_semantics=("parallel",),        # shard over v7x's 2 TCs
            vmem_limit_bytes=32 * 1024 * 1024,        # covers tb=2048 on v5e
        ),
        cost_estimate=pl.CostEstimate(
            flops=flops, transcendentals=0, bytes_accessed=bytes_accessed
        ),
    )(x_flat, *flat_params)
    return out[:B]


def dqn_reference(x, weights, biases):
    """Pure-JAX reference matching the kernel's bf16-in / f32-accumulate math."""
    B, L, W = x.shape
    h = x.reshape(B, L * W)
    n = len(weights)
    for i, (w, b) in enumerate(zip(weights, biases)):
        h = jnp.dot(h.astype(jnp.bfloat16), w.astype(jnp.bfloat16),
                    preferred_element_type=jnp.float32) + b.astype(jnp.float32)
        if i < n - 1:
            h = jnp.maximum(h, 0.0)
    return h


def init_dqn_params(key, in_features, hidden_layer_sizes, n_actions):
    """PyTorch-style Linear init: U(-1/sqrt(fan_in), 1/sqrt(fan_in)).

    Weights are stored as (in, out) so the kernel right-multiplies
    (equivalent to PyTorch's x @ W.T with W of shape (out, in)).
    """
    sizes = [in_features] + list(hidden_layer_sizes) + [n_actions]
    weights, biases = [], []
    for i in range(len(sizes) - 1):
        fan_in, fan_out = sizes[i], sizes[i + 1]
        key, kw, kb = jax.random.split(key, 3)
        bound = 1.0 / jnp.sqrt(jnp.float32(fan_in))
        weights.append(
            jax.random.uniform(kw, (fan_in, fan_out), jnp.float32, -bound, bound)
        )
        biases.append(
            jax.random.uniform(kb, (fan_out,), jnp.float32, -bound, bound)
        )
    return weights, biases


if __name__ == "__main__":
    # Shapes consistent with DQN(input_shape=(B, L, W),
    # hidden_layer_sizes=[32, 32], n_actions=4).
    B, L, W = 2, 16, 16
    hidden_layer_sizes = [32, 32]
    n_actions = 4

    key = jax.random.PRNGKey(0)
    key, kx = jax.random.split(key)
    x = jax.random.normal(kx, (B, L, W), dtype=jnp.float32)

    weights, biases = init_dqn_params(key, L * W, hidden_layer_sizes, n_actions)

    # f32 input path (PyTorch-equivalent call signature).
    out = jax.block_until_ready(dqn_forward(x, weights, biases))
    assert out.shape == (B, n_actions), out.shape
    assert out.dtype == jnp.float32
    ref = dqn_reference(x, weights, biases)
    assert jnp.allclose(out, ref, atol=1e-3, rtol=1e-3), float(
        jnp.max(jnp.abs(out - ref))
    )

    # Multi-tile / padded-batch path (grid > 1, B not a multiple of the tile).
    B2 = 300
    key, kx2 = jax.random.split(key)
    x2 = jax.random.normal(kx2, (B2, L, W), dtype=jnp.float32)
    out2 = jax.block_until_ready(dqn_forward(x2, weights, biases, block_b=128))
    ref2 = dqn_reference(x2, weights, biases)
    assert out2.shape == (B2, n_actions), out2.shape
    assert jnp.allclose(out2, ref2, atol=1e-3, rtol=1e-3), float(
        jnp.max(jnp.abs(out2 - ref2))
    )

    # bf16 end-to-end fast path (halves input HBM traffic, no in-kernel cast).
    x3 = x2.astype(jnp.bfloat16)
    out3 = jax.block_until_ready(dqn_forward(x3, weights, biases))
    ref3 = dqn_reference(x3, weights, biases)
    assert out3.shape == (B2, n_actions), out3.shape
    assert jnp.allclose(out3, ref3, atol=1e-3, rtol=1e-3), float(
        jnp.max(jnp.abs(out3 - ref3))
    )

    print("KERNEL_OK")
</pallas_src>

<mosaic_0001>
module attributes {stable_mosaic.version = 11 : i64} {
  func.func @_mlp_kernel(%arg0: i32, %arg1: memref<8x256xf32, #tpu.memory_space<vmem>>, %arg2: memref<256x32xbf16, #tpu.memory_space<vmem>>, %arg3: memref<1x32xf32, #tpu.memory_space<vmem>>, %arg4: memref<32x32xbf16, #tpu.memory_space<vmem>>, %arg5: memref<1x32xf32, #tpu.memory_space<vmem>>, %arg6: memref<32x4xbf16, #tpu.memory_space<vmem>>, %arg7: memref<1x4xf32, #tpu.memory_space<vmem>>, %arg8: memref<8x4xf32, #tpu.memory_space<vmem>>) attributes {dimension_semantics = [#tpu.dimension_semantics<parallel>], iteration_bounds = array<i64: 1>, scalar_prefetch = 0 : i64, scratch_operands = 0 : i64, tpu.core_type = #tpu.core_type<tc>, window_params = [{transform_indices = @transform_0, window_bounds = array<i64: 8, 256>}, {pipeline_mode = #tpu.pipeline_mode<synchronous>, transform_indices = @transform_1, window_bounds = array<i64: 256, 32>}, {pipeline_mode = #tpu.pipeline_mode<synchronous>, transform_indices = @transform_2, window_bounds = array<i64: 1, 32>}, {pipeline_mode = #tpu.pipeline_mode<synchronous>, transform_indices = @transform_3, window_bounds = array<i64: 32, 32>}, {pipeline_mode = #tpu.pipeline_mode<synchronous>, transform_indices = @transform_4, window_bounds = array<i64: 1, 32>}, {pipeline_mode = #tpu.pipeline_mode<synchronous>, transform_indices = @transform_5, window_bounds = array<i64: 32, 4>}, {pipeline_mode = #tpu.pipeline_mode<synchronous>, transform_indices = @transform_6, window_bounds = array<i64: 1, 4>}, {transform_indices = @transform_7, window_bounds = array<i64: 8, 4>}]} {
    %c0 = arith.constant 0 : index
    %c0_0 = arith.constant 0 : index
    %0 = vector.load %arg1[%c0, %c0_0] : memref<8x256xf32, #tpu.memory_space<vmem>>, vector<8x256xf32>
    %c0_1 = arith.constant 0 : index
    %c0_2 = arith.constant 0 : index
    %1 = vector.load %arg2[%c0_1, %c0_2] : memref<256x32xbf16, #tpu.memory_space<vmem>>, vector<256x32xbf16>
    %c0_3 = arith.constant 0 : index
    %c0_4 = arith.constant 0 : index
    %2 = vector.load %arg3[%c0_3, %c0_4] : memref<1x32xf32, #tpu.memory_space<vmem>>, vector<1x32xf32>
    %3 = arith.truncf %0 : vector<8x256xf32> to vector<8x256xbf16>
    %cst = arith.constant dense<0.000000e+00> : vector<8x32xf32>
    %4 = tpu.matmul %3, %1, %cst {dimension_numbers = #tpu.dot_dimension_numbers<[1], [0], [0], [1], [0, 0, 1, 1], [], []>} : vector<8x256xbf16>, vector<256x32xbf16>, vector<8x32xf32> -> vector<8x32xf32>
    %5 = vector.broadcast %2 : vector<1x32xf32> to vector<8x32xf32>
    %6 = arith.addf %4, %5 : vector<8x32xf32>
    %cst_5 = arith.constant 0.000000e+00 : f32
    %7 = vector.broadcast %cst_5 : f32 to vector<8x32xf32>
    %8 = arith.maximumf %6, %7 : vector<8x32xf32>
    %c0_6 = arith.constant 0 : index
    %c0_7 = arith.constant 0 : index
    %9 = vector.load %arg4[%c0_6, %c0_7] : memref<32x32xbf16, #tpu.memory_space<vmem>>, vector<32x32xbf16>
    %c0_8 = arith.constant 0 : index
    %c0_9 = arith.constant 0 : index
    %10 = vector.load %arg5[%c0_8, %c0_9] : memref<1x32xf32, #tpu.memory_space<vmem>>, vector<1x32xf32>
    %11 = arith.truncf %8 : vector<8x32xf32> to vector<8x32xbf16>
    %cst_10 = arith.constant dense<0.000000e+00> : vector<8x32xf32>
    %12 = tpu.matmul %11, %9, %cst_10 {dimension_numbers = #tpu.dot_dimension_numbers<[1], [0], [0], [1], [0, 0, 1, 1], [], []>} : vector<8x32xbf16>, vector<32x32xbf16>, vector<8x32xf32> -> vector<8x32xf32>
    %13 = vector.broadcast %10 : vector<1x32xf32> to vector<8x32xf32>
    %14 = arith.addf %12, %13 : vector<8x32xf32>
    %cst_11 = arith.constant 0.000000e+00 : f32
    %15 = vector.broadcast %cst_11 : f32 to vector<8x32xf32>
    %16 = arith.maximumf %14, %15 : vector<8x32xf32>
    %c0_12 = arith.constant 0 : index
    %c0_13 = arith.constant 0 : index
    %17 = vector.load %arg6[%c0_12, %c0_13] : memref<32x4xbf16, #tpu.memory_space<vmem>>, vector<32x4xbf16>
    %c0_14 = arith.constant 0 : index
    %c0_15 = arith.constant 0 : index
    %18 = vector.load %arg7[%c0_14, %c0_15] : memref<1x4xf32, #tpu.memory_space<vmem>>, vector<1x4xf32>
    %19 = arith.truncf %16 : vector<8x32xf32> to vector<8x32xbf16>
    %cst_16 = arith.constant dense<0.000000e+00> : vector<8x4xf32>
    %20 = tpu.matmul %19, %17, %cst_16 {dimension_numbers = #tpu.dot_dimension_numbers<[1], [0], [0], [1], [0, 0, 1, 1], [], []>} : vector<8x32xbf16>, vector<32x4xbf16>, vector<8x4xf32> -> vector<8x4xf32>
    %21 = vector.broadcast %18 : vector<1x4xf32> to vector<8x4xf32>
    %22 = arith.addf %20, %21 : vector<8x4xf32>
    %c0_17 = arith.constant 0 : index
    %c0_18 = arith.constant 0 : index
    %23 = vector.load %arg8[%c0_17, %c0_18] : memref<8x4xf32, #tpu.memory_space<vmem>>, vector<8x4xf32>
    tpu.vector_store %arg8[%c0_17, %c0_18], %22 {strides = array<i32>} : memref<8x4xf32, #tpu.memory_space<vmem>>, vector<8x4xf32>,
    return
  }
  func.func @transform_0(%arg0: i32) -> (i32, i32) {
    %c0_i32 = arith.constant 0 : i32
    %c0_i32_0 = arith.constant 0 : i32
    return %arg0, %c0_i32 : i32, i32
  }
  func.func @transform_1(%arg0: i32) -> (i32, i32) {
    %c0_i32 = arith.constant 0 : i32
    %c0_i32_0 = arith.constant 0 : i32
    %c0_i32_1 = arith.constant 0 : i32
    return %c0_i32, %c0_i32_0 : i32, i32
  }
  func.func @transform_2(%arg0: i32) -> (i32, i32) {
    %c0_i32 = arith.constant 0 : i32
    %c0_i32_0 = arith.constant 0 : i32
    %c0_i32_1 = arith.constant 0 : i32
    return %c0_i32, %c0_i32_0 : i32, i32
  }
  func.func @transform_3(%arg0: i32) -> (i32, i32) {
    %c0_i32 = arith.constant 0 : i32
    %c0_i32_0 = arith.constant 0 : i32
    %c0_i32_1 = arith.constant 0 : i32
    return %c0_i32, %c0_i32_0 : i32, i32
  }
  func.func @transform_4(%arg0: i32) -> (i32, i32) {
    %c0_i32 = arith.constant 0 : i32
    %c0_i32_0 = arith.constant 0 : i32
    %c0_i32_1 = arith.constant 0 : i32
    return %c0_i32, %c0_i32_0 : i32, i32
  }
  func.func @transform_5(%arg0: i32) -> (i32, i32) {
    %c0_i32 = arith.constant 0 : i32
    %c0_i32_0 = arith.constant 0 : i32
    %c0_i32_1 = arith.constant 0 : i32
    return %c0_i32, %c0_i32_0 : i32, i32
  }
  func.func @transform_6(%arg0: i32) -> (i32, i32) {
    %c0_i32 = arith.constant 0 : i32
    %c0_i32_0 = arith.constant 0 : i32
    %c0_i32_1 = arith.constant 0 : i32
    return %c0_i32, %c0_i32_0 : i32, i32
  }
  func.func @transform_7(%arg0: i32) -> (i32, i32) {
    %c0_i32 = arith.constant 0 : i32
    %c0_i32_0 = arith.constant 0 : i32
    return %arg0, %c0_i32 : i32, i32
  }
}

</mosaic_0001>

<bundles_post_ra>
// kernel: tpu_custom_call.1
= control target key start
LH: loop header
LB: loop body
LE: loop exit
PB: predicated region body
PF: predicated region fallthrough
CT: control target
= control target key end

     0   :  { %v440_v21 = vmov 0.0   ;;  %vm441_vm0 = vmmov 0   ;;  %vm231_vm1 = vcmask 261120   ;;  %vm343_vm2 = vcmask 31744   ;;  %s564_s1 = inlined_call_operand.vmem [shape: bf16[256,32], index: 1, kind: input, shape index: {}]   ;;  %s565_s0 = inlined_call_operand.vmem [shape: f32[8,256], index: 0, kind: input, shape index: {}]   ;;  %s566_s3 = inlined_call_operand.vmem [shape: bf16[32,32], index: 3, kind: input, shape index: {}]   ;;  %s567_s5 = inlined_call_operand.vmem [shape: bf16[32,4], index: 5, kind: input, shape index: {}]   ;;  %s568_s2 = inlined_call_operand.vmem [shape: f32[1,32], index: 2, kind: input, shape index: {}]   ;;  %s569_s4 = inlined_call_operand.vmem [shape: f32[1,32], index: 4, kind: input, shape index: {}]   ;;  %s570_s6 = inlined_call_operand.vmem [shape: f32[1,4], index: 6, kind: input, shape index: {}]   ;;  %s571_s7 = inlined_call_operand.vmem [shape: f32[8,4], index: 7, kind: output, shape index: {}]  }
   0x1   :  { %v420_v0 = vld [vmem:[%s564_s1 + $0x40] sm:$0xff]   ;;  %v422_v2 = vld [vmem:[%s564_s1 + $0x48] sm:$0xff]   ;;  %v424_v4 = vld [vmem:[%s564_s1 + $0x50] sm:$0xff]   ;;  %402 = vmatprep.subr.bf16.mxu1 %v440_v21  ;;  %406 = vmatprep.mubr.msk.bf16.mxu1 %vm441_vm0, %v440_v21 }
   0x2   :  { %v421_v1 = vld [vmem:[%s564_s1] sm:$0xff]   ;;  %374 = vmatprep.subr.bf16.mxu0 %v420_v0  ;;  %v423_v3 = vld [vmem:[%s564_s1 + $0x8] sm:$0xff]   ;;  %v425_v5 = vld [vmem:[%s564_s1 + $0x10] sm:$0xff]  }
   0x3   :  { %375 = vmatpush3.bf16.msra.mxu0 %v421_v1  ;;  %v426_v6 = vld [vmem:[%s564_s1 + $0x58] sm:$0xff]   ;;  %v428_v8 = vld [vmem:[%s564_s1 + $0x60] sm:$0xff]   ;;  %v430_v10 = vld [vmem:[%s564_s1 + $0x68] sm:$0xff]  }
   0x4   :  { %376 = vmatprep.subr.bf16.mxu0 %v422_v2  ;;  %v427_v7 = vld [vmem:[%s564_s1 + $0x18] sm:$0xff]   ;;  %v429_v9 = vld [vmem:[%s564_s1 + $0x20] sm:$0xff]   ;;  %v28_v11 = vld [vmem:[%s565_s0 + $0x8] sm:$0xff] }
   0x5   :  { %v63_v12 = vpack.c.bf16 %v28_v11, %v28_v11  ;;  %v431_v13 = vld [vmem:[%s564_s1 + $0x28] sm:$0xff]   ;;  %v432_v14 = vld [vmem:[%s564_s1 + $0x70] sm:$0xff]   ;;  %v434_v16 = vld [vmem:[%s564_s1 + $0x78] sm:$0xff]  }
   0x6   :  { %v433_v15 = vld [vmem:[%s564_s1 + $0x30] sm:$0xff]   ;;  %v435_v17 = vld [vmem:[%s564_s1 + $0x38] sm:$0xff]   ;;  %v27_v18 = vld [vmem:[%s565_s0] sm:$0xff] }
   0x7   :  { %377 = vmatpush3.bf16.msra.mxu0 %v423_v3  ;;  %198 = vmatprep.mubr.bf16.mxu0 %v63_v12  ;;  %v62_v19 = vpack.c.bf16 %v27_v18, %v27_v18  ;;  %v436_v20 = vld [vmem:[%s566_s3] sm:$0xff]   ;;  %v437_v22 = vld [vmem:[%s566_s3 + $0x8] sm:$0xff]  }
   0x8   :  { %378 = vmatprep.subr.bf16.mxu0 %v424_v4  ;;  %403 = vmatpush3.bf16.msra.mxu1 %v436_v20  ;;  %v349_v24 = vld [vmem:[%s568_s2] ss:$0 sm:$0xff]  ;;  %v439_v33 = vld [vmem:[%s567_s5 + $0x8] sm:$0xff]  }
   0x9   :  { %404 = vmatprep.subr.bf16.mxu1 %v440_v21  ;;  %v438_v31 = vld [vmem:[%s567_s5] sm:$0xff]  }
   0xa   :  { %v366_v34 = vld [vmem:[%s569_s4] ss:$0 sm:$0xff] }
   0xb   :  { %379 = vmatpush3.bf16.msra.mxu0 %v425_v5  ;;  %v370_v42 = vld [vmem:[%s570_s6] ss:$0 sm:$0xff] }
   0xc   :  { %380 = vmatprep.subr.bf16.mxu0 %v426_v6  ;;  %405 = vmatpush3.bf16.msra.mxu1 %v437_v22 }
   0xd   :  { %410 = vmatprep.subr.bf16.mxu1 %v440_v21 }
   0xf   :  { %381 = vmatpush3.bf16.msra.mxu0 %v427_v7 }
  0x10   :  { %382 = vmatprep.subr.bf16.mxu0 %v428_v8 }
  0x13   :  { %383 = vmatpush3.bf16.msra.mxu0 %v429_v9 }
  0x14   :  { %384 = vmatprep.subr.bf16.mxu0 %v430_v10 }
  0x17   :  { %385 = vmatpush3.bf16.msra.mxu0 %v431_v13 }
  0x18   :  { %386 = vmatprep.subr.bf16.mxu0 %v432_v14 }
  0x1b   :  { %387 = vmatpush3.bf16.msra.mxu0 %v433_v15 }
  0x1c   :  { %388 = vmatprep.subr.bf16.mxu0 %v434_v16 }
  0x1f   :  { %389 = vmatpush3.bf16.msra.mxu0 %v435_v17 }
  0x22   :  { %199 = vmatmul.mubr.bf16.vlgmr.msra.gmra.mrb[0].mxu0 %v62_v19 }
  0xf5   :  { %v390_v23 = vpop.f32.mrb[0].mxu0 }
  0xf6   :  { %v391_v25 = vpop.f32.mrb[1].mxu0 }
  0xf7   :  { %v392_v26 = vadd.f32 %v391_v25, %v390_v23  ;;  %v393_v27 = vpop.f32.mrb[2].mxu0 }
  0xf8   :  { %v394_v28 = vpop.f32.mrb[3].mxu0 }
  0xf9   :  { %v201_v29 = vadd.f32 %v392_v26, %v349_v24 }
  0xfb   :  { %v206_v30 = vmax.f32 %v201_v29, 0.0 }
  0xfd   :  { %v212_v32 = vpack.c.bf16 %v206_v30, %v206_v30 }
  0xff   :  { %407 = vmatmul.mubr.msk.bf16.vlgmr.msra.gmra.mrb[0].mxu1 %vm231_vm1, %v212_v32 }
 0x100   :  { %411 = vmatpush3.bf16.msra.mxu1 %v438_v31  ;;  %414 = vmatprep.mubr.msk.bf16.mxu1 %vm441_vm0, %v440_v21 }
 0x101   :  { %412 = vmatprep.subr.bf16.mxu1 %v440_v21 }
 0x104   :  { %413 = vmatpush3.bf16.msra.mxu1 %v439_v33 }
 0x1d2   :  { %v269_v35 = vpop.f32.mrb[0].mxu1 }
 0x1d3   :  { %v270_v36 = vadd.f32 %v366_v34, %v269_v35  ;;  %v408_v37 = vpop.f32.mrb[1].mxu1 }
 0x1d4   :  { %v272_v38 = vpop.f32.mrb[2].mxu1 }
 0x1d5   :  { %v275_v39 = vmax.f32 %v270_v36, 0.0  ;;  %v409_v40 = vpop.f32.mrb[3].mxu1 }
 0x1d7   :  { %v281_v41 = vpack.c.bf16 %v275_v39, %v275_v39 }
 0x1d9   :  { %415 = vmatmul.mubr.msk.bf16.vlgmr.msra.gmra.mrb[4].mxu1 %vm231_vm1, %v281_v41 }
 0x2ac   :  { %v337_v43 = vpop.f32.mrb[4].mxu1 }
 0x2ad   :  { %v338_v44 = vadd.f32 %v370_v42, %v337_v43  ;;  %v416_v45 = vpop.f32.mrb[5].mxu1 }
 0x2ae   :  { %v340_v46 = vpop.f32.mrb[6].mxu1 }
 0x2af   :  { %344 = vst.msk [vmem:[%s571_s7] sm:$0xff] %vm343_vm2, %v338_v44  ;;  %v417_v47 = vpop.f32.mrb[7].mxu1 }

</bundles_post_ra>
